<compile_context>
chip_gen: v7x
topology: tpu7x:2x2x1
jax: 0.10.0
libtpu: 0.0.40
codegen_flags: <defaults>
</compile_context>

<pallas_src>
import functools

import jax
import jax.numpy as jnp
from jax import lax
from jax.experimental import pallas as pl
from jax.experimental.pallas import tpu as pltpu

LANE = 128
# ~2 MiB of f32 logits per grid step: big enough for ~85%+ of HBM roofline,
# small enough that double-buffered in+out (~8 MiB) fits the 16 MiB default
# scoped VMEM on v5e without raising vmem_limit_bytes.
_TARGET_BLOCK_ELEMS = 512 * 1024


def _round_up(a, b):
    return (a + b - 1) // b * b


def _int_pow(v, n):
    """v ** n for a small static non-negative integer n via VPU multiplies."""
    if n == 0:
        return jnp.ones_like(v)
    r = v
    for _ in range(n - 1):
        r = r * v
    return r


def _poly1_focal_kernel(*refs, alpha, gamma, epsilon, labels_are_ids, has_weight):
    """One (C, Sb) tile of poly-1 focal loss; one-hot built in-kernel."""
    if has_weight:
        x_ref, t_ref, w_ref, out_ref = refs
    else:
        x_ref, t_ref, out_ref = refs
        w_ref = None

    x = x_ref[...].astype(jnp.float32)                      # (C, Sb) logits

    if labels_are_ids:
        lab = t_ref[...]                                     # (1, Sb) int32 class ids
        cls = lax.broadcasted_iota(jnp.int32, x.shape, 0)    # row index == class id
        y = (lab == cls).astype(jnp.float32)                 # fused one-hot
    else:
        y = t_ref[...].astype(jnp.float32)                   # (C, Sb) one-hot targets

    # Single exp serves both the sigmoid and the stable BCE-with-logits term.
    e = jnp.exp(-jnp.abs(x))
    ce = jnp.maximum(x, 0.0) - x * y + jnp.log1p(e)          # BCE-with-logits, 'none'
    if w_ref is not None:
        ce = ce * w_ref[...].astype(jnp.float32)             # (C,1) per-class weight

    inv = 1.0 / (1.0 + e)
    p = jnp.where(x >= 0.0, inv, e * inv)                    # sigmoid(x), exact

    pt = y * p + (1.0 - y) * (1.0 - p)
    one_m_pt = 1.0 - pt

    g = float(gamma)
    if g.is_integer() and 0 <= int(g) <= 16:
        pow_g = _int_pow(one_m_pt, int(g))                   # no transcendental pow
    else:
        pow_g = jnp.power(one_m_pt, g)                       # single generic pow
    pow_g1 = pow_g * one_m_pt                                # (1-pt)^(gamma+1)

    fl = ce * pow_g
    if alpha >= 0.0:
        alpha_t = alpha * y + (1.0 - alpha) * (1.0 - y)
        fl = alpha_t * fl

    out_ref[...] = (fl + epsilon * pow_g1).astype(out_ref.dtype)


def _run_poly1_focal(x3, t3, weight, *, alpha, gamma, epsilon, labels_are_ids):
    """x3: [B, C, S] logits; t3: [B, 1, S] int32 ids or [B, C, S] one-hot."""
    B, C, S = x3.shape
    dtype = x3.dtype

    sb_cap = max(LANE, (_TARGET_BLOCK_ELEMS // max(C, 1)) // LANE * LANE)
    s_pad = _round_up(S, LANE)
    sb = min(s_pad, sb_cap)
    s_pad = _round_up(s_pad, sb)

    if s_pad != S:
        # Ragged spatial tail only: one pad pass; padded outputs sliced off below.
        pad = s_pad - S
        x3 = jnp.pad(x3, ((0, 0), (0, 0), (0, pad)))
        if labels_are_ids:
            t3 = jnp.pad(t3, ((0, 0), (0, 0), (0, pad)), constant_values=C)
        else:
            t3 = jnp.pad(t3, ((0, 0), (0, 0), (0, pad)))

    grid = (B, s_pad // sb)
    x_spec = pl.BlockSpec((None, C, sb), lambda n, s: (n, 0, s))
    if labels_are_ids:
        t_spec = pl.BlockSpec((None, 1, sb), lambda n, s: (n, 0, s))
    else:
        t_spec = pl.BlockSpec((None, C, sb), lambda n, s: (n, 0, s))

    has_weight = weight is not None
    in_specs = [x_spec, t_spec]
    inputs = [x3, t3]
    if has_weight:
        w2 = jnp.asarray(weight, jnp.float32).reshape(C, 1)
        in_specs.append(pl.BlockSpec((C, 1), lambda n, s: (0, 0)))  # resident
        inputs.append(w2)

    kernel = functools.partial(
        _poly1_focal_kernel, alpha=float(alpha), gamma=float(gamma),
        epsilon=float(epsilon), labels_are_ids=labels_are_ids,
        has_weight=has_weight)

    out = pl.pallas_call(
        kernel,
        out_shape=jax.ShapeDtypeStruct((B, C, s_pad), dtype),
        grid=grid,
        in_specs=in_specs,
        out_specs=pl.BlockSpec((None, C, sb), lambda n, s: (n, 0, s)),
        compiler_params=pltpu.CompilerParams(
            dimension_semantics=("parallel", "parallel")),
    )(*inputs)

    if s_pad != S:
        out = out[:, :, :S]
    return out


def poly1_focal_loss(logits, labels, *, num_classes, epsilon=1.0, alpha=0.25,
                     gamma=2.0, reduction="none", weight=None,
                     label_is_onehot=False):
    """JAX/Pallas equivalent of Poly1FocalLoss.forward.

    Note: `weight` is interpreted as a per-class rescaling vector of shape [C]
    broadcast along the class dimension (the documented intent of the module).
    """
    if logits.ndim == 2:
        # [N, C] logits: present as [1, C, N] so the class dim is the sublane
        # axis and N is the lane-dense axis.
        x3 = jnp.swapaxes(logits, 0, 1)[None]                    # [1, C, N]
        if label_is_onehot:
            t3 = jnp.swapaxes(labels, 0, 1)[None]                # [1, C, N]
            labels_are_ids = False
        else:
            t3 = labels.astype(jnp.int32)[None, None, :]         # [1, 1, N]
            labels_are_ids = True
        out3 = _run_poly1_focal(x3, t3, weight, alpha=alpha, gamma=gamma,
                                epsilon=epsilon, labels_are_ids=labels_are_ids)
        poly1 = jnp.swapaxes(out3[0], 0, 1)                      # [N, C]
    else:
        # [N, C, ...] logits.
        N, C = logits.shape[0], logits.shape[1]
        S = 1
        for d in logits.shape[2:]:
            S *= d
        x3 = logits.reshape(N, C, S)
        if label_is_onehot:
            t3 = labels.reshape(N, C, S)
            labels_are_ids = False
        else:
            t3 = labels.astype(jnp.int32).reshape(N, 1, S)
            labels_are_ids = True
        out3 = _run_poly1_focal(x3, t3, weight, alpha=alpha, gamma=gamma,
                                epsilon=epsilon, labels_are_ids=labels_are_ids)
        poly1 = out3.reshape(logits.shape)

    # reduction is cheap glue; default is 'none' (per-element tensor).
    if reduction == "mean":
        poly1 = poly1.mean()
    elif reduction == "sum":
        poly1 = poly1.sum()
    return poly1


def _reference(logits, labels, *, num_classes, epsilon, alpha, gamma):
    """Pure-jnp reference mirroring the PyTorch code, for validation."""
    p = jax.nn.sigmoid(logits)
    y = jax.nn.one_hot(labels, num_classes, dtype=logits.dtype, axis=1)
    ce = jnp.maximum(logits, 0) - logits * y + jnp.log1p(jnp.exp(-jnp.abs(logits)))
    pt = y * p + (1 - y) * (1 - p)
    fl = ce * (1 - pt) ** gamma
    alpha_t = alpha * y + (1 - alpha) * (1 - y)
    fl = alpha_t * fl
    return fl + epsilon * (1 - pt) ** (gamma + 1)


if __name__ == "__main__":
    key = jax.random.PRNGKey(0)
    k1, k2 = jax.random.split(key)

    N, C, H, W = 2, 4, 16, 16
    logits = jax.random.normal(k1, (N, C, H, W), dtype=jnp.float32)
    labels = jax.random.randint(k2, (N, H, W), 0, C, dtype=jnp.int32)

    out = poly1_focal_loss(
        logits, labels, num_classes=C, epsilon=1.0, alpha=0.25, gamma=2.0,
        reduction="none", weight=None, label_is_onehot=False)
    out = jax.block_until_ready(out)

    ref = _reference(logits, labels, num_classes=C, epsilon=1.0, alpha=0.25,
                     gamma=2.0)
    assert out.shape == logits.shape and out.dtype == logits.dtype
    assert jnp.allclose(out, ref, atol=1e-5, rtol=1e-4)

    print("KERNEL_OK")
</pallas_src>

<mosaic_0001>
module attributes {stable_mosaic.version = 11 : i64} {
  func.func @_poly1_focal_kernel(%arg0: i32, %arg1: i32, %arg2: memref<1x4x256xf32, #tpu.memory_space<vmem>>, %arg3: memref<1x1x256xi32, #tpu.memory_space<vmem>>, %arg4: memref<1x4x256xf32, #tpu.memory_space<vmem>>) attributes {dimension_semantics = [#tpu.dimension_semantics<parallel>, #tpu.dimension_semantics<parallel>], iteration_bounds = array<i64: 2, 1>, scalar_prefetch = 0 : i64, scratch_operands = 0 : i64, tpu.core_type = #tpu.core_type<tc>, window_params = [{transform_indices = @transform_0, window_bounds = array<i64: 1, 4, 256>}, {transform_indices = @transform_1, window_bounds = array<i64: 1, 1, 256>}, {transform_indices = @transform_2, window_bounds = array<i64: 1, 4, 256>}]} {
    %c0 = arith.constant 0 : index
    %c0_0 = arith.constant 0 : index
    %c0_1 = arith.constant 0 : index
    %0 = vector.load %arg2[%c0, %c0_0, %c0_1] : memref<1x4x256xf32, #tpu.memory_space<vmem>>, vector<1x4x256xf32>
    %1 = vector.shape_cast %0 : vector<1x4x256xf32> to vector<4x256xf32>
    %c0_2 = arith.constant 0 : index
    %c0_3 = arith.constant 0 : index
    %c0_4 = arith.constant 0 : index
    %2 = vector.load %arg3[%c0_2, %c0_3, %c0_4] : memref<1x1x256xi32, #tpu.memory_space<vmem>>, vector<1x1x256xi32>
    %3 = vector.shape_cast %2 : vector<1x1x256xi32> to vector<1x256xi32>
    %4 = tpu.iota {dimensions = array<i32: 0>} : vector<4x256xi32>
    %5 = vector.broadcast %3 : vector<1x256xi32> to vector<4x256xi32>
    %6 = arith.cmpi eq, %5, %4 : vector<4x256xi32>
    %7 = arith.extui %6 : vector<4x256xi1> to vector<4x256xi32>
    %8 = arith.sitofp %7 : vector<4x256xi32> to vector<4x256xf32>
    %9 = math.absf %1 : vector<4x256xf32>
    %cst = arith.constant 0.000000e+00 : f32
    %10 = vector.broadcast %cst : f32 to vector<4x256xf32>
    %11 = arith.subf %10, %9 : vector<4x256xf32>
    %12 = math.exp %11 : vector<4x256xf32>
    %cst_5 = arith.constant 0.000000e+00 : f32
    %13 = vector.broadcast %cst_5 : f32 to vector<4x256xf32>
    %14 = arith.maximumf %1, %13 : vector<4x256xf32>
    %15 = arith.mulf %1, %8 : vector<4x256xf32>
    %16 = arith.subf %14, %15 : vector<4x256xf32>
    %17 = math.log1p %12 : vector<4x256xf32>
    %18 = arith.addf %16, %17 : vector<4x256xf32>
    %cst_6 = arith.constant 1.000000e+00 : f32
    %19 = vector.broadcast %cst_6 : f32 to vector<4x256xf32>
    %20 = arith.addf %19, %12 : vector<4x256xf32>
    %cst_7 = arith.constant 1.000000e+00 : f32
    %21 = vector.broadcast %cst_7 : f32 to vector<4x256xf32>
    %22 = arith.divf %21, %20 : vector<4x256xf32>
    %cst_8 = arith.constant 0.000000e+00 : f32
    %23 = vector.broadcast %cst_8 : f32 to vector<4x256xf32>
    %24 = arith.cmpf oge, %1, %23 : vector<4x256xf32>
    %25 = arith.mulf %12, %22 : vector<4x256xf32>
    %26 = arith.select %24, %22, %25 : vector<4x256xi1>, vector<4x256xf32>
    %27 = arith.mulf %8, %26 : vector<4x256xf32>
    %cst_9 = arith.constant 1.000000e+00 : f32
    %28 = vector.broadcast %cst_9 : f32 to vector<4x256xf32>
    %29 = arith.subf %28, %8 : vector<4x256xf32>
    %cst_10 = arith.constant 1.000000e+00 : f32
    %30 = vector.broadcast %cst_10 : f32 to vector<4x256xf32>
    %31 = arith.subf %30, %26 : vector<4x256xf32>
    %32 = arith.mulf %29, %31 : vector<4x256xf32>
    %33 = arith.addf %27, %32 : vector<4x256xf32>
    %cst_11 = arith.constant 1.000000e+00 : f32
    %34 = vector.broadcast %cst_11 : f32 to vector<4x256xf32>
    %35 = arith.subf %34, %33 : vector<4x256xf32>
    %36 = arith.mulf %35, %35 : vector<4x256xf32>
    %37 = arith.mulf %36, %35 : vector<4x256xf32>
    %38 = arith.mulf %18, %36 : vector<4x256xf32>
    %cst_12 = arith.constant 2.500000e-01 : f32
    %39 = vector.broadcast %cst_12 : f32 to vector<4x256xf32>
    %40 = arith.mulf %39, %8 : vector<4x256xf32>
    %cst_13 = arith.constant 1.000000e+00 : f32
    %41 = vector.broadcast %cst_13 : f32 to vector<4x256xf32>
    %42 = arith.subf %41, %8 : vector<4x256xf32>
    %cst_14 = arith.constant 7.500000e-01 : f32
    %43 = vector.broadcast %cst_14 : f32 to vector<4x256xf32>
    %44 = arith.mulf %43, %42 : vector<4x256xf32>
    %45 = arith.addf %40, %44 : vector<4x256xf32>
    %46 = arith.mulf %45, %38 : vector<4x256xf32>
    %cst_15 = arith.constant 1.000000e+00 : f32
    %47 = vector.broadcast %cst_15 : f32 to vector<4x256xf32>
    %48 = arith.mulf %47, %37 : vector<4x256xf32>
    %49 = arith.addf %46, %48 : vector<4x256xf32>
    %c0_16 = arith.constant 0 : index
    %c0_17 = arith.constant 0 : index
    %c0_18 = arith.constant 0 : index
    %50 = vector.load %arg4[%c0_16, %c0_17, %c0_18] : memref<1x4x256xf32, #tpu.memory_space<vmem>>, vector<1x4x256xf32>
    %51 = vector.shape_cast %50 : vector<1x4x256xf32> to vector<4x256xf32>
    %52 = vector.shape_cast %49 : vector<4x256xf32> to vector<1x4x256xf32>
    tpu.vector_store %arg4[%c0_16, %c0_17, %c0_18], %52 {strides = array<i32>} : memref<1x4x256xf32, #tpu.memory_space<vmem>>, vector<1x4x256xf32>,
    return
  }
  func.func @transform_0(%arg0: i32, %arg1: i32) -> (i32, i32, i32) {
    %c0_i32 = arith.constant 0 : i32
    %c0_i32_0 = arith.constant 0 : i32
    return %arg0, %c0_i32, %arg1 : i32, i32, i32
  }
  func.func @transform_1(%arg0: i32, %arg1: i32) -> (i32, i32, i32) {
    %c0_i32 = arith.constant 0 : i32
    %c0_i32_0 = arith.constant 0 : i32
    return %arg0, %c0_i32, %arg1 : i32, i32, i32
  }
  func.func @transform_2(%arg0: i32, %arg1: i32) -> (i32, i32, i32) {
    %c0_i32 = arith.constant 0 : i32
    %c0_i32_0 = arith.constant 0 : i32
    return %arg0, %c0_i32, %arg1 : i32, i32, i32
  }
}

</mosaic_0001>

<bundles_post_ra>
// kernel: tpu_custom_call.1
= control target key start
LH: loop header
LB: loop body
LE: loop exit
PB: predicated region body
PF: predicated region fallthrough
CT: control target
= control target key end

     0   :  { %7 = vsyncpa [#allocation3], 0  ;;  %s923_s0 = inlined_call_operand.hbm [shape: f32[2,4,256], index: 0, kind: input, shape index: {}]   ;;  %s924_s1 = inlined_call_operand.hbm [shape: s32[2,1,256], index: 1, kind: input, shape index: {}]   ;;  %s925_s2 = inlined_call_operand.hbm [shape: f32[2,4,256], index: 2, kind: output, shape index: {}]  }
   0x1   :  { %9 = vsyncpa [#allocation3 + $0x1], 0 }
   0x2   :  { %10 = vsyncpa [#allocation6], 0 }
   0x3   :  { %12 = vsyncpa [#allocation6 + $0x1], 0 }
   0x4   :  { %13 = vsyncpa [#allocation4], 0 }
   0x5   :  { %15 = vsyncpa [#allocation4 + $0x1], 0  ;;  %s704_s9 = smov 0   ;;  %s706_s10 = smov 0  }
   0x6   :  { %s708_s11 = smov 0   ;;  %s710_s12 = smov 0  }
   0x7   :  { %s712_s13 = smov 0   ;;  %s714_s14 = smov 0  }
   0x8 LB: > { %s439_s15 = sadd.s32 4294967295, %s683_s14   ;;  %s440_s16 = sadd.s32 4294967294, %s683_s14   ;;  %s683_s14 = sphi %s714_s14, %s21_s14   ;;  %s679_s13 = sphi %s712_s13, %s945_s13   ;;  %s675_s12 = sphi %s710_s12, %s944_s12   ;;  %s671_s11 = sphi %s708_s11, %s943_s11   ;;  %s667_s10 = sphi %s706_s10, %s942_s10   ;;  %s663_s9 = sphi %s704_s9, %s941_s9  }
   0x9   : > { %s33_s17 = sadd.s32 1, %s679_s13  ;;  %s42_s18 = sadd.s32 1, %s671_s11 }
   0xa   : > { %p35_p0 = scmp.ge.s32.totalorder %s33_s17, 2  ;;  %p49_p1 = scmp.ne.s32.totalorder %s671_s11, %s667_s10 }
   0xb   : > { %p50_p2 = scmp.eq.s32.totalorder %s683_s14, 0  ;;  %p55_p3 = scmp.ne.s32.totalorder %s667_s10, %s663_s9 }
   0xc   : > { %s947_s17 = smov (%p35_p0, %s33_s17), 0  ;;  %p56_p5 = scmp.eq.s32.totalorder %s439_s15, 0 }
   0xd   : > { %p745_p4 = por %p50_p2, %p49_p1  ;;  %s37_s20 = ssub.s32 %s679_s13, %s947_s17 }
   0xe   : > { %p109_p6 = scmp.eq.s32.totalorder %s439_s15, 1  ;;  %p40_p7 = scmp.eq.s32.totalorder %s37_s20, 0 }
   0xf   : > { %p751_p8 = por %p56_p5, %p55_p3  ;;  %p115_p10 = scmp.eq.s32.totalorder %s440_s16, 1 }
  0x10   : > { %p755_p9 = por %p109_p6, %p49_p1  ;;  %p480_p13 = scmp.lt.s32.totalorder %s683_s14, 2 }
  0x11   : > { %s929_s21 = scalar_select %p751_p8, 1, 0 }
  0x12   : > { %s930_s22 = scalar_select %p755_p9, 1, 0 }
  0x13   : > { %s760_s23 = scalar_select %p40_p7, %s671_s11, %s42_s18  }
  0x14   : > { %p762_p11 = por %p115_p10, %p55_p3  ;;  %s769_s25 = sand.u32 1, %s671_s11  }
  0x15   : > { %s443_s26 = sshll.u32 %s769_s25, 3  ;;  %s460_s27 = sshll.u32 %s679_s13, 7 }
  0x16   : > { %s931_s24 = scalar_select %p762_p11, 1, 0 }
  0x17   : > { %s776_s30 = scalar_lea.hbm %s923_s0, %s460_s27  ;;  %s139_s3 = scalar_lea.vmem [#allocation2], %s443_s26 }
  0x18   : > { %s149_s4 = sshll.u32 %s139_s3, 4  ;;  %p782_p0 = pnand %p480_p13, %p745_p4  ;;  %s778_s4 = int_to_ptr.vmem [resolvable:$true] %s149_s4 }
  0x19   : > { %s136_s6 = scalar_lea.sflag [#allocation3], %s769_s25  ;;  %s537_s7 = scalar_lea.hbm %s776_s30, 128 }
  0x1a   : > { %p538_p3 = scmp.ne.s32.totalorder %s776_s30, %s537_s7  ;;  %p539_p5 = pneg %p782_p0 }
  0x1b   : > { %s542_s16 = scalar_lea.hbm %s923_s0, 256  ;;  %p543_p4 = scmp.lt.u32.totalorder %s776_s30, %s923_s0 }
  0x1c   : > { %p540_p6 = pnand %p539_p5, %p538_p3  ;;  %p544_p10 = scmp.lt.u32.totalorder %s542_s16, %s537_s7 }
  0x1d   : > { %p546_p12 = scmp.lt.u32.totalorder %s537_s7, %s776_s30 }
  0x1e   : > { %p541_p7 = pneg %p540_p6  ;;  %p545_p13 = por %p544_p10, %p543_p4 }
  0x20   : > { %p547_p1 = por %p546_p12, %p545_p13 }
  0x22   : > { %p548_p2 = pnand %p547_p1, %p541_p7 }
  0x24   : > { %551 = shalt.err (!%p548_p2)
}
  0x25   : > { %s552_s20 = scalar_lea.vmem %s778_s4, 128  ;;  %s685_s26 = smov [#allocation2]  }
  0x26   : > { %p553_p3 = scmp.ne.s32.totalorder %s778_s4, %s552_s20  ;;  %s557_s27 = sshll.u32 %s685_s26, 4  ;;  %s558_s27 = int_to_ptr.vmem [resolvable:$false] %s557_s27 }
  0x27   : > { %s559_s28 = scalar_lea.vmem %s558_s27, 256  ;;  %p560_p9 = scmp.lt.s32.totalorder %s778_s4, %s558_s27 }
  0x28   : > { %p555_p6 = pnand %p553_p3, %p539_p5  ;;  %p561_p4 = scmp.lt.s32.totalorder %s559_s28, %s552_s20 }
  0x2a   : > { %p556_p11 = pneg %p555_p6  ;;  %p562_p10 = por %p561_p4, %p560_p9 }
  0x2c   : > { %p563_p12 = pnand %p562_p10, %p556_p11 }
  0x2e   : > { %566 = shalt.err (!%p563_p12)
}
  0x2f   : > { %472 = dma.hbm_to_vmem [thread:$0]  (!%p782_p0), %s776_s30, 128, %s778_s4, %s136_s6  }
  0x30   : > { %p933_p1 = scmp.lt.s32.totalorder %s683_s14, 3  ;;  %p934_p2 = scmp.ge.s32.totalorder %s683_s14, 1 }
  0x31   : > { %s446_s3 = sshll.u32 %s769_s25, 1  ;;  %s461_s7 = sshll.u32 %s679_s13, 5 }
  0x32   : > { %p818_p7 = pnand %p934_p2, %p933_p1  ;;  %s827_s16 = scalar_lea.hbm %s924_s1, %s461_s7 }
  0x33   : > { %s160_s18 = scalar_lea.vmem [#allocation5], %s446_s3  ;;  %s157_s30 = scalar_lea.sflag [#allocation6], %s769_s25 }
  0x34   : > { %s935_s29 = scalar_select %p818_p7, 1, 0 }
  0x35   : > { %s170_s19 = sshll.u32 %s160_s18, 4  ;;  %s567_s4 = scalar_lea.hbm %s827_s16, 32  ;;  %s171_s19 = int_to_ptr.vmem [resolvable:$true] %s170_s19 }
  0x36   : > { %p568_p9 = scmp.ne.s32.totalorder %s827_s16, %s567_s4  ;;  %s572_s26 = scalar_lea.hbm %s924_s1, 64 }
  0x37   : > { %p573_p3 = scmp.lt.u32.totalorder %s827_s16, %s924_s1  ;;  %p574_p6 = scmp.lt.u32.totalorder %s572_s26, %s567_s4 }
  0x38   : > { %p570_p11 = pnand %p568_p9, %p539_p5  ;;  %p576_p10 = scmp.lt.u32.totalorder %s567_s4, %s827_s16 }
  0x39   : > { %p575_p4 = por %p574_p6, %p573_p3 }
  0x3a   : > { %p571_p13 = pneg %p570_p11 }
  0x3b   : > { %p577_p12 = por %p576_p10, %p575_p4 }
  0x3d   : > { %p578_p1 = pnand %p577_p12, %p571_p13 }
  0x3f   : > { %581 = shalt.err (!%p578_p1)
}
  0x40   : > { %s582_s25 = scalar_lea.vmem %s171_s19, 32  ;;  %s686_s3 = smov [#allocation5]  }
  0x41   : > { %p583_p2 = scmp.ne.s32.totalorder %s171_s19, %s582_s25  ;;  %s587_s7 = sshll.u32 %s686_s3, 4  ;;  %s588_s7 = int_to_ptr.vmem [resolvable:$false] %s587_s7 }
  0x42   : > { %s589_s8 = scalar_lea.vmem %s588_s7, 64  ;;  %p590_p8 = scmp.lt.s32.totalorder %s171_s19, %s588_s7 }
  0x43   : > { %p585_p9 = pnand %p583_p2, %p539_p5  ;;  %p591_p7 = scmp.lt.s32.totalorder %s589_s8, %s582_s25 }
  0x45   : > { %p586_p11 = pneg %p585_p9  ;;  %p592_p3 = por %p591_p7, %p590_p8 }
  0x47   : > { %p593_p6 = pnand %p592_p3, %p586_p11 }
  0x49   : > { %596 = shalt.err (!%p593_p6)
}
  0x4a   : > { %475 = dma.hbm_to_vmem [thread:$0]  (!%p782_p0), %s827_s16, 32, %s171_s19, %s157_s30  }
  0x4b   : > { %p936_p13 = scmp.ne.s32.totalorder %s935_s29, 0 }
  0x4c   : > { %s852_s15 = sand.u32 (!%p936_p13), 1, %s667_s10   ;;  %p937_p8 = scmp.ne.s32.totalorder (!%p936_p13), %s929_s21, 0 }
  0x4d   : > { %179 = sbr.rel (%p936_p13) target bundleno = 160 (0xa0), region = 28  ;;  %s450_s18 = sshll.u32 (!%p936_p13), %s852_s15, 3 }
  0x4e   : > { %s182_s4 = scalar_lea.sflag (!%p936_p13), [#allocation3], %s852_s15  ;;  %s185_s6 = scalar_lea.vmem (!%p936_p13), [#allocation2], %s450_s18 }
  0x54   : > { %650 = dma.done.wait (%p937_p8), %s182_s4, 128  }
  0x55   : > { %652 = vsyncadd (%p937_p8), %s182_s4, 4294967168  ;;  %s451_s5 = sshll.u32 %s852_s15, 1  ;;  %s191_s29 = scalar_lea.sflag [#allocation6], %s852_s15 }
  0x56   : > { %s194_s16 = scalar_lea.vmem [#allocation5], %s451_s5 }
  0x57   : > { %654 = dma.done.wait (%p937_p8), %s191_s29, 32  }
  0x58   : > { %656 = vsyncadd (%p937_p8), %s191_s29, 4294967264  ;;  %v223_v0 = vld [vmem:[%s185_s6] sm:$0xff]  ;;  %v225_v4 = vlaneseq  ;;  %v224_v9 = vld [vmem:[%s194_s16] sm:$0x3]  ;;  %v687_v13 = vmov 0.0   ;;  %s219_s21 = scalar_lea.vmem [#allocation7], %s450_s18 }
  0x59   : > { %v241_v1 = vand.u32 2147483647, %v223_v0  ;;  %vm265_vm2 = vcmp.ge.f32.partialorder %v223_v0, 0.0  ;;  %v245_v29 = vmax.f32 %v223_v0, 0.0  ;;  %s329_s19 = sshll.u32 %s219_s21, 4  ;;  %s462_s30 = sshll.u32 %s675_s12, 7  ;;  %s871_s19 = int_to_ptr.vmem [resolvable:$true] %s329_s19 }
  0x5a   : > { %v226_v5 = vshrl.u32 %v225_v4, 7  ;;  %s876_s27 = scalar_lea.hbm %s925_s2, %s462_s30  ;;  %s313_s28 = scalar_lea.sflag [#allocation4], %s852_s15 }
  0x5b   : > { %v242_v2 = vsub.f32 0.0, %v241_v1  ;;  %s597_s25 = scalar_lea.vmem %s871_s19, 128  ;;  %p938_p5 = scmp.ne.s32.totalorder %s930_s22, 0 }
  0x5c   : > { %v229_v8 = vsub.s32 0, %v226_v5  ;;  %v233_v10 = vsub.s32 1, %v226_v5  ;;  %p598_p0 = scmp.ne.s32.totalorder %s871_s19, %s597_s25  ;;  %s688_s12 = smov [#allocation7]  }
  0x5d   : > { %v243_v3 = vmul.f32 1.442695, %v242_v2  ;;  %s601_s3 = sshll.u32 %s688_s12, 4  ;;  %s602_s3 = int_to_ptr.vmem [resolvable:$false] %s601_s3 }
  0x5e   : > { %v230_v11 = vrot.slane %v224_v9, %v229_v8  ;;  %v234_v12 = vrot.slane %v224_v9, %v233_v10  ;;  %p599_p7 = pnand %p598_p0, %p938_p5  ;;  %s603_s7 = scalar_lea.vmem %s602_s3, 256 }
  0x5f   : > { %531 = vpow2.f32 %v243_v3  ;;  %p604_p10 = scmp.lt.s32.totalorder %s871_s19, %s602_s3  ;;  %p605_p12 = scmp.lt.s32.totalorder %s603_s7, %s597_s25 }
  0x60   : > { %vm235_vm0 = vcmp.eq.s32.totalorder %v230_v11, %v226_v5  ;;  %vm236_vm1 = vcmp.eq.s32.totalorder %v234_v12, %v226_v5  ;;  %p600_p4 = pneg %p599_p7 }
  0x61   : > { %v453_v14 = vsel %vm235_vm0, 1.0, %v687_v13  ;;  %v454_v17 = vsel %vm236_vm1, 1.0, %v687_v13  ;;  %p606_p1 = por %p605_p12, %p604_p10 }
  0x62   : > { %v248_v19 = vcombine.low %v453_v14, %v454_v17  ;;  %v273_v20 = vsub.f32 1.0, %v453_v14  ;;  %v274_v23 = vsub.f32 1.0, %v454_v17  ;;  %v294_v44 = vmul.f32 0.25, %v453_v14 }
  0x63   : > { %v295_v48 = vmul.f32 0.25, %v454_v17  ;;  %p607_p2 = pnand %p606_p1, %p600_p4 }
  0x64   : > { %v250_v30 = vmul.f32 %v248_v19, %v223_v0  ;;  %v296_v45 = vmul.f32 0.75, %v273_v20  ;;  %v297_v49 = vmul.f32 0.75, %v274_v23 }
  0x66   : > { %v251_v38 = vsub.f32 %v245_v29, %v250_v30  ;;  %v298_v51 = vadd.f32 %v296_v45, %v294_v44  ;;  %v299_v54 = vadd.f32 %v297_v49, %v295_v48 }
  0x69   : > { %v532_v6 = vpop.eup %531 }
  0x6a   : > { %v252_v7 = vadd.f32 1.0, %v532_v6  ;;  %v255_v15 = vmul.f32 -0.5, %v532_v6  ;;  %v258_v25 = vand.u32 2147483647, %v532_v6 }
  0x6c   : > { %533 = vrcp.f32 %v252_v7  ;;  %v256_v21 = vadd.f32 1.0, %v255_v15  ;;  %vm259_vm3 = vcmp.lt.f32.partialorder %v258_v25, 0.0004427343 }
  0x6d   : > { %535 = vlog2.f32 %v252_v7 }
  0x6e   : > { %v257_v35 = vmul.f32 %v532_v6, %v256_v21 }
  0x76   : > { %v534_v16 = vpop.eup %533 }
  0x77   : > { %v266_v18 = vmul.f32 %v534_v16, %v532_v6  ;;  %v536_v24 = vpop.eup %535 }
  0x78   : > { %v254_v34 = vmul.f32 0.6931472, %v536_v24 }
  0x79   : > { %v267_v22 = vsel %vm265_vm2, %v534_v16, %v266_v18 }
  0x7a   : > { %v269_v26 = vcombine.high %v267_v22, %v267_v22  ;;  %v271_v27 = vmul.f32 %v453_v14, %v267_v22  ;;  %v275_v28 = vsub.f32 1.0, %v267_v22  ;;  %v260_v41 = vsel %vm259_vm3, %v257_v35, %v254_v34 }
  0x7b   : > { %v261_v46 = vadd.f32 %v260_v41, %v251_v38 }
  0x7c   : > { %v272_v31 = vmul.f32 %v454_v17, %v269_v26  ;;  %v277_v32 = vcombine.high %v275_v28, %v275_v28  ;;  %v279_v33 = vmul.f32 %v275_v28, %v273_v20 }
  0x7e   : > { %v280_v36 = vmul.f32 %v277_v32, %v274_v23  ;;  %v281_v37 = vadd.f32 %v279_v33, %v271_v27 }
  0x80   : > { %v282_v39 = vadd.f32 %v280_v36, %v272_v31  ;;  %v283_v40 = vsub.f32 1.0, %v281_v37 }
  0x82   : > { %v284_v42 = vsub.f32 1.0, %v282_v39  ;;  %v285_v43 = vmul.f32 %v283_v40, %v283_v40 }
  0x84   : > { %v286_v47 = vmul.f32 %v284_v42, %v284_v42  ;;  %v287_v52 = vmul.f32 %v285_v43, %v283_v40 }
  0x86   : > { %v291_v50 = vcombine.low %v285_v43, %v286_v47  ;;  %v288_v55 = vmul.f32 %v286_v47, %v284_v42 }
  0x88   : > { %v293_v53 = vmul.f32 %v291_v50, %v261_v46 }
  0x8a   : > { %v301_v56 = vcombine.high %v293_v53, %v293_v53  ;;  %v303_v57 = vmul.f32 %v298_v51, %v293_v53 }
  0x8c   : > { %v304_v58 = vmul.f32 %v301_v56, %v299_v54  ;;  %v305_v59 = vadd.f32 %v303_v57, %v287_v52 }
  0x8e   : > { %v306_v60 = vadd.f32 %v304_v58, %v288_v55 }
  0x90   : > { %v309_v61 = vcombine.low %v305_v59, %v306_v60 }
  0x92   : > { %311 = vst [vmem:[%s219_s21] sm:$0xff] %v309_v61 }
  0x93   : > { %610 = shalt.err (!%p607_p2)
}
  0x94   : > { %s611_s8 = scalar_lea.hbm %s876_s27, 128  ;;  %s615_s4 = scalar_lea.hbm %s925_s2, 256 }
  0x95   : > { %p612_p9 = scmp.ne.s32.totalorder %s876_s27, %s611_s8  ;;  %p616_p6 = scmp.lt.u32.totalorder %s876_s27, %s925_s2 }
  0x96   : > { %p617_p13 = scmp.lt.u32.totalorder %s615_s4, %s611_s8  ;;  %p619_p0 = scmp.lt.u32.totalorder %s611_s8, %s876_s27 }
  0x97   : > { %p613_p11 = pnand %p612_p9, %p938_p5 }
  0x98   : > { %p618_p8 = por %p617_p13, %p616_p6 }
  0x99   : > { %p614_p3 = pneg %p613_p11 }
  0x9a   : > { %p620_p7 = por %p619_p0, %p618_p8 }
  0x9c   : > { %p621_p4 = pnand %p620_p7, %p614_p3 }
  0x9e   : > { %624 = shalt.err (!%p621_p4)
}
  0x9f   : > { %467 = dma.vmem_to_hbm [thread:$0]  (%p938_p5), %s871_s19, 128, %s876_s27, %s313_s28  }
  0xa0 PF: > { %s341_s29 = sand.u32 1, %s663_s9   ;;  %p939_p10 = scmp.ne.s32.totalorder %s931_s24, 0 }
  0xa1   : > { %p940_p12 = scmp.ge.s32.totalorder %s683_s14, 2  ;;  %s342_s16 = scalar_lea.sflag [#allocation4], %s341_s29 }
  0xa3   : > { %p477_p1 = pnand %p940_p12, %p939_p10 }
  0xa5   : > { %658 = dma.done.wait (!%p477_p1), %s342_s16, 128  }
  0xa6   : > { %660 = vsyncadd (!%p477_p1), %s342_s16, 4294967168  ;;  %s21_s14 = sadd.s32 1, %s683_s14   ;;  %s941_s9 = smov %s667_s10 }
  0xa7   : > { %p18_p2 = scmp.ge.s32.totalorder %s21_s14, 4   ;;  %s942_s10 = smov %s671_s11 }
  0xa8   : > { %s943_s11 = smov %s760_s23  ;;  %s944_s12 = smov %s679_s13 }
  0xa9   : > { %s945_s13 = smov %s947_s17  ;;  %20 = sbr.rel (!%p18_p2) target bundleno = 8 (0x8), region = 86 }
  0xb0   :  { %347 = vsyncpa [#allocation3], 1 }
  0xb1   :  { %349 = vsyncpa [#allocation3 + $0x1], 1 }
  0xb2   :  { %350 = vsyncpa [#allocation6], 1 }
  0xb3   :  { %352 = vsyncpa [#allocation6 + $0x1], 1 }
  0xb4   :  { %353 = vsyncpa [#allocation4], 1 }
  0xb5   :  { %355 = vsyncpa [#allocation4 + $0x1], 1 }

</bundles_post_ra>
